<compile_context>
chip_gen: v7x
topology: tpu7x:2x2x1
jax: 0.10.0
libtpu: 0.0.40
codegen_flags: <defaults>
</compile_context>

<pallas_src>
import functools

import numpy as np
import jax
import jax.numpy as jnp
from jax.experimental import pallas as pl
from jax.experimental.pallas import tpu as pltpu

SLOWFAST_ALPHA = 4
_MAX_INFLIGHT_DMAS = 4  # frame copies kept in flight simultaneously


def _slow_indices(num_frames: int, num_slow: int) -> np.ndarray:
    """Replicates torch.linspace(0, T-1, T//alpha).long().

    torch.linspace (default float32) evaluates start + i*step for the first
    half and end - (steps-1-i)*step for the second half, then .long()
    truncates toward zero.  Reproduce that in float32 for bit-for-bit parity.
    """
    if num_slow <= 0:
        return np.zeros((0,), dtype=np.int64)
    if num_slow == 1:
        return np.zeros((1,), dtype=np.int64)  # linspace(start, end, 1) == start
    start = np.float32(0.0)
    end = np.float32(num_frames - 1)
    step = np.float32((end - start) / np.float32(num_slow - 1))
    i = np.arange(num_slow)
    halfway = num_slow // 2
    vals = np.where(
        i < halfway,
        start + step * i.astype(np.float32),
        end - step * (num_slow - 1 - i).astype(np.float32),
    )
    return np.trunc(vals).astype(np.int64)


def _gather_dma_kernel(x_hbm, o_hbm, copy_sems, *, slow_idx, depth):
    """Issue one HBM->HBM DMA per selected frame; ring of `depth` semaphores.

    x_hbm: (C, T, HW) input frames, left in HBM (no auto-DMA).
    o_hbm: (C, n_slow, HW) output slow pathway, left in HBM.
    copy_sems: (depth,) DMA semaphores.
    slow_idx: static tuple of source frame indices (trace-time constants).
    """
    copies = []
    for i, t in enumerate(slow_idx):
        if i >= depth:
            # Reclaim this semaphore slot before reusing it.
            copies[i - depth].wait()
        cp = pltpu.make_async_copy(
            x_hbm.at[:, pl.ds(t, 1), :],
            o_hbm.at[:, pl.ds(i, 1), :],
            copy_sems.at[i % depth],
        )
        cp.start()
        copies.append(cp)
    # Drain the copies that are still in flight.
    for cp in copies[max(0, len(copies) - depth):]:
        cp.wait()


def pack_pathway(frames: jnp.ndarray):
    """Returns [slow_pathway, fast_pathway], matching PackPathway.forward."""
    C, T, H, W = frames.shape
    n_slow = T // SLOWFAST_ALPHA
    fast = frames  # identity (no copy), same as PyTorch returning `frames`

    if n_slow == 0:
        # Degenerate case: index_select with an empty index set.
        return [jnp.zeros((C, 0, H, W), dtype=frames.dtype), fast]

    slow_idx = tuple(int(v) for v in _slow_indices(T, n_slow))
    depth = max(1, min(n_slow, _MAX_INFLIGHT_DMAS))

    # Flatten spatial dims (free, contiguous reshape): each per-channel DMA
    # segment is then one contiguous H*W run, independent of 128-alignment.
    hw = H * W
    x = frames.reshape(C, T, hw)

    itemsize = jnp.dtype(frames.dtype).itemsize
    bytes_moved = 2 * C * n_slow * hw * itemsize  # read + write

    kernel = functools.partial(_gather_dma_kernel, slow_idx=slow_idx, depth=depth)

    slow = pl.pallas_call(
        kernel,
        out_shape=jax.ShapeDtypeStruct((C, n_slow, hw), frames.dtype),
        in_specs=[pl.BlockSpec(memory_space=pl.ANY)],
        out_specs=pl.BlockSpec(memory_space=pl.ANY),
        scratch_shapes=[pltpu.SemaphoreType.DMA((depth,))],
        cost_estimate=pl.CostEstimate(
            flops=0, transcendentals=0, bytes_accessed=bytes_moved
        ),
    )(x)

    slow = slow.reshape(C, n_slow, H, W)
    return [slow, fast]


if __name__ == "__main__":
    key = jax.random.PRNGKey(0)
    # Small video-like input: 3 channels, 16 frames, 16x16 spatial.
    C, T, H, W = 3, 16, 16, 16
    frames = jax.random.normal(key, (C, T, H, W), dtype=jnp.float32)

    slow, fast = pack_pathway(frames)
    jax.block_until_ready(slow)
    jax.block_until_ready(fast)

    # Reference check (plain JAX) for the gather semantics.
    n_slow = T // SLOWFAST_ALPHA
    ref_idx = jnp.asarray(_slow_indices(T, n_slow))
    ref_slow = jnp.take(frames, ref_idx, axis=1)
    assert slow.shape == (C, n_slow, H, W)
    assert fast.shape == (C, T, H, W)
    assert jnp.array_equal(slow, ref_slow)
    assert jnp.array_equal(fast, frames)

    print("KERNEL_OK")
</pallas_src>

<mosaic_0001>
module attributes {stable_mosaic.version = 11 : i64} {
  func.func @_gather_dma_kernel(%arg0: memref<3x16x256xf32, #tpu.memory_space<any>>, %arg1: memref<3x4x256xf32, #tpu.memory_space<any>>, %arg2: memref<4x!tpu.dma_semaphore, #tpu.memory_space<semaphore_mem>>) attributes {dimension_semantics = [], scalar_prefetch = 0 : i64, scratch_operands = 1 : i64, tpu.core_type = #tpu.core_type<tc>} {
    %c0_i32 = arith.constant 0 : i32
    %c0_i32_0 = arith.constant 0 : i32
    %c0_i32_1 = arith.constant 0 : i32
    %c0_i32_2 = arith.constant 0 : i32
    %0 = tpu.memref_slice %arg0[%c0_i32_0, %c0_i32_1, %c0_i32_2] : memref<3x16x256xf32, #tpu.memory_space<any>> -> memref<3x1x256xf32, #tpu.memory_space<any>>
    %c0_i32_3 = arith.constant 0 : i32
    %c0_i32_4 = arith.constant 0 : i32
    %c0_i32_5 = arith.constant 0 : i32
    %1 = tpu.memref_slice %arg1[%c0_i32_3, %c0_i32_4, %c0_i32_5] : memref<3x4x256xf32, #tpu.memory_space<any>> -> memref<3x1x256xf32, #tpu.memory_space<any>>
    %2 = tpu.memref_slice %arg2[%c0_i32] : memref<4x!tpu.dma_semaphore, #tpu.memory_space<semaphore_mem>> -> memref<1x!tpu.dma_semaphore, #tpu.memory_space<semaphore_mem>>
    %3 = tpu.memref_squeeze %2 : memref<1x!tpu.dma_semaphore, #tpu.memory_space<semaphore_mem>> -> memref<!tpu.dma_semaphore, #tpu.memory_space<semaphore_mem>>
    tpu.enqueue_dma source(%0 : memref<3x1x256xf32, #tpu.memory_space<any>>) target(%1 : memref<3x1x256xf32, #tpu.memory_space<any>>) target_semaphore(%3 : memref<!tpu.dma_semaphore, #tpu.memory_space<semaphore_mem>>)
    %c1_i32 = arith.constant 1 : i32
    %c0_i32_6 = arith.constant 0 : i32
    %c5_i32 = arith.constant 5 : i32
    %c0_i32_7 = arith.constant 0 : i32
    %4 = tpu.memref_slice %arg0[%c0_i32_6, %c5_i32, %c0_i32_7] : memref<3x16x256xf32, #tpu.memory_space<any>> -> memref<3x1x256xf32, #tpu.memory_space<any>>
    %c0_i32_8 = arith.constant 0 : i32
    %c1_i32_9 = arith.constant 1 : i32
    %c0_i32_10 = arith.constant 0 : i32
    %5 = tpu.memref_slice %arg1[%c0_i32_8, %c1_i32_9, %c0_i32_10] : memref<3x4x256xf32, #tpu.memory_space<any>> -> memref<3x1x256xf32, #tpu.memory_space<any>>
    %6 = tpu.memref_slice %arg2[%c1_i32] : memref<4x!tpu.dma_semaphore, #tpu.memory_space<semaphore_mem>> -> memref<1x!tpu.dma_semaphore, #tpu.memory_space<semaphore_mem>>
    %7 = tpu.memref_squeeze %6 : memref<1x!tpu.dma_semaphore, #tpu.memory_space<semaphore_mem>> -> memref<!tpu.dma_semaphore, #tpu.memory_space<semaphore_mem>>
    tpu.enqueue_dma source(%4 : memref<3x1x256xf32, #tpu.memory_space<any>>) target(%5 : memref<3x1x256xf32, #tpu.memory_space<any>>) target_semaphore(%7 : memref<!tpu.dma_semaphore, #tpu.memory_space<semaphore_mem>>)
    %c2_i32 = arith.constant 2 : i32
    %c0_i32_11 = arith.constant 0 : i32
    %c10_i32 = arith.constant 10 : i32
    %c0_i32_12 = arith.constant 0 : i32
    %8 = tpu.memref_slice %arg0[%c0_i32_11, %c10_i32, %c0_i32_12] : memref<3x16x256xf32, #tpu.memory_space<any>> -> memref<3x1x256xf32, #tpu.memory_space<any>>
    %c0_i32_13 = arith.constant 0 : i32
    %c2_i32_14 = arith.constant 2 : i32
    %c0_i32_15 = arith.constant 0 : i32
    %9 = tpu.memref_slice %arg1[%c0_i32_13, %c2_i32_14, %c0_i32_15] : memref<3x4x256xf32, #tpu.memory_space<any>> -> memref<3x1x256xf32, #tpu.memory_space<any>>
    %10 = tpu.memref_slice %arg2[%c2_i32] : memref<4x!tpu.dma_semaphore, #tpu.memory_space<semaphore_mem>> -> memref<1x!tpu.dma_semaphore, #tpu.memory_space<semaphore_mem>>
    %11 = tpu.memref_squeeze %10 : memref<1x!tpu.dma_semaphore, #tpu.memory_space<semaphore_mem>> -> memref<!tpu.dma_semaphore, #tpu.memory_space<semaphore_mem>>
    tpu.enqueue_dma source(%8 : memref<3x1x256xf32, #tpu.memory_space<any>>) target(%9 : memref<3x1x256xf32, #tpu.memory_space<any>>) target_semaphore(%11 : memref<!tpu.dma_semaphore, #tpu.memory_space<semaphore_mem>>)
    %c3_i32 = arith.constant 3 : i32
    %c0_i32_16 = arith.constant 0 : i32
    %c15_i32 = arith.constant 15 : i32
    %c0_i32_17 = arith.constant 0 : i32
    %12 = tpu.memref_slice %arg0[%c0_i32_16, %c15_i32, %c0_i32_17] : memref<3x16x256xf32, #tpu.memory_space<any>> -> memref<3x1x256xf32, #tpu.memory_space<any>>
    %c0_i32_18 = arith.constant 0 : i32
    %c3_i32_19 = arith.constant 3 : i32
    %c0_i32_20 = arith.constant 0 : i32
    %13 = tpu.memref_slice %arg1[%c0_i32_18, %c3_i32_19, %c0_i32_20] : memref<3x4x256xf32, #tpu.memory_space<any>> -> memref<3x1x256xf32, #tpu.memory_space<any>>
    %14 = tpu.memref_slice %arg2[%c3_i32] : memref<4x!tpu.dma_semaphore, #tpu.memory_space<semaphore_mem>> -> memref<1x!tpu.dma_semaphore, #tpu.memory_space<semaphore_mem>>
    %15 = tpu.memref_squeeze %14 : memref<1x!tpu.dma_semaphore, #tpu.memory_space<semaphore_mem>> -> memref<!tpu.dma_semaphore, #tpu.memory_space<semaphore_mem>>
    tpu.enqueue_dma source(%12 : memref<3x1x256xf32, #tpu.memory_space<any>>) target(%13 : memref<3x1x256xf32, #tpu.memory_space<any>>) target_semaphore(%15 : memref<!tpu.dma_semaphore, #tpu.memory_space<semaphore_mem>>)
    %c0_i32_21 = arith.constant 0 : i32
    %c0_i32_22 = arith.constant 0 : i32
    %c0_i32_23 = arith.constant 0 : i32
    %c0_i32_24 = arith.constant 0 : i32
    %16 = tpu.memref_slice %arg0[%c0_i32_22, %c0_i32_23, %c0_i32_24] : memref<3x16x256xf32, #tpu.memory_space<any>> -> memref<3x1x256xf32, #tpu.memory_space<any>>
    %c0_i32_25 = arith.constant 0 : i32
    %c0_i32_26 = arith.constant 0 : i32
    %c0_i32_27 = arith.constant 0 : i32
    %17 = tpu.memref_slice %arg1[%c0_i32_25, %c0_i32_26, %c0_i32_27] : memref<3x4x256xf32, #tpu.memory_space<any>> -> memref<3x1x256xf32, #tpu.memory_space<any>>
    %18 = tpu.memref_slice %arg2[%c0_i32_21] : memref<4x!tpu.dma_semaphore, #tpu.memory_space<semaphore_mem>> -> memref<1x!tpu.dma_semaphore, #tpu.memory_space<semaphore_mem>>
    %19 = tpu.memref_squeeze %18 : memref<1x!tpu.dma_semaphore, #tpu.memory_space<semaphore_mem>> -> memref<!tpu.dma_semaphore, #tpu.memory_space<semaphore_mem>>
    tpu.wait_dma2 semaphore(%19 : memref<!tpu.dma_semaphore, #tpu.memory_space<semaphore_mem>>) src(%16 : memref<3x1x256xf32, #tpu.memory_space<any>>) dst(%17 : memref<3x1x256xf32, #tpu.memory_space<any>>)
    %c1_i32_28 = arith.constant 1 : i32
    %c0_i32_29 = arith.constant 0 : i32
    %c5_i32_30 = arith.constant 5 : i32
    %c0_i32_31 = arith.constant 0 : i32
    %20 = tpu.memref_slice %arg0[%c0_i32_29, %c5_i32_30, %c0_i32_31] : memref<3x16x256xf32, #tpu.memory_space<any>> -> memref<3x1x256xf32, #tpu.memory_space<any>>
    %c0_i32_32 = arith.constant 0 : i32
    %c1_i32_33 = arith.constant 1 : i32
    %c0_i32_34 = arith.constant 0 : i32
    %21 = tpu.memref_slice %arg1[%c0_i32_32, %c1_i32_33, %c0_i32_34] : memref<3x4x256xf32, #tpu.memory_space<any>> -> memref<3x1x256xf32, #tpu.memory_space<any>>
    %22 = tpu.memref_slice %arg2[%c1_i32_28] : memref<4x!tpu.dma_semaphore, #tpu.memory_space<semaphore_mem>> -> memref<1x!tpu.dma_semaphore, #tpu.memory_space<semaphore_mem>>
    %23 = tpu.memref_squeeze %22 : memref<1x!tpu.dma_semaphore, #tpu.memory_space<semaphore_mem>> -> memref<!tpu.dma_semaphore, #tpu.memory_space<semaphore_mem>>
    tpu.wait_dma2 semaphore(%23 : memref<!tpu.dma_semaphore, #tpu.memory_space<semaphore_mem>>) src(%20 : memref<3x1x256xf32, #tpu.memory_space<any>>) dst(%21 : memref<3x1x256xf32, #tpu.memory_space<any>>)
    %c2_i32_35 = arith.constant 2 : i32
    %c0_i32_36 = arith.constant 0 : i32
    %c10_i32_37 = arith.constant 10 : i32
    %c0_i32_38 = arith.constant 0 : i32
    %24 = tpu.memref_slice %arg0[%c0_i32_36, %c10_i32_37, %c0_i32_38] : memref<3x16x256xf32, #tpu.memory_space<any>> -> memref<3x1x256xf32, #tpu.memory_space<any>>
    %c0_i32_39 = arith.constant 0 : i32
    %c2_i32_40 = arith.constant 2 : i32
    %c0_i32_41 = arith.constant 0 : i32
    %25 = tpu.memref_slice %arg1[%c0_i32_39, %c2_i32_40, %c0_i32_41] : memref<3x4x256xf32, #tpu.memory_space<any>> -> memref<3x1x256xf32, #tpu.memory_space<any>>
    %26 = tpu.memref_slice %arg2[%c2_i32_35] : memref<4x!tpu.dma_semaphore, #tpu.memory_space<semaphore_mem>> -> memref<1x!tpu.dma_semaphore, #tpu.memory_space<semaphore_mem>>
    %27 = tpu.memref_squeeze %26 : memref<1x!tpu.dma_semaphore, #tpu.memory_space<semaphore_mem>> -> memref<!tpu.dma_semaphore, #tpu.memory_space<semaphore_mem>>
    tpu.wait_dma2 semaphore(%27 : memref<!tpu.dma_semaphore, #tpu.memory_space<semaphore_mem>>) src(%24 : memref<3x1x256xf32, #tpu.memory_space<any>>) dst(%25 : memref<3x1x256xf32, #tpu.memory_space<any>>)
    %c3_i32_42 = arith.constant 3 : i32
    %c0_i32_43 = arith.constant 0 : i32
    %c15_i32_44 = arith.constant 15 : i32
    %c0_i32_45 = arith.constant 0 : i32
    %28 = tpu.memref_slice %arg0[%c0_i32_43, %c15_i32_44, %c0_i32_45] : memref<3x16x256xf32, #tpu.memory_space<any>> -> memref<3x1x256xf32, #tpu.memory_space<any>>
    %c0_i32_46 = arith.constant 0 : i32
    %c3_i32_47 = arith.constant 3 : i32
    %c0_i32_48 = arith.constant 0 : i32
    %29 = tpu.memref_slice %arg1[%c0_i32_46, %c3_i32_47, %c0_i32_48] : memref<3x4x256xf32, #tpu.memory_space<any>> -> memref<3x1x256xf32, #tpu.memory_space<any>>
    %30 = tpu.memref_slice %arg2[%c3_i32_42] : memref<4x!tpu.dma_semaphore, #tpu.memory_space<semaphore_mem>> -> memref<1x!tpu.dma_semaphore, #tpu.memory_space<semaphore_mem>>
    %31 = tpu.memref_squeeze %30 : memref<1x!tpu.dma_semaphore, #tpu.memory_space<semaphore_mem>> -> memref<!tpu.dma_semaphore, #tpu.memory_space<semaphore_mem>>
    tpu.wait_dma2 semaphore(%31 : memref<!tpu.dma_semaphore, #tpu.memory_space<semaphore_mem>>) src(%28 : memref<3x1x256xf32, #tpu.memory_space<any>>) dst(%29 : memref<3x1x256xf32, #tpu.memory_space<any>>)
    return
  }
}

</mosaic_0001>

<bundles_post_ra>
// kernel: tpu_custom_call.1
= control target key start
LH: loop header
LB: loop body
LE: loop exit
PB: predicated region body
PF: predicated region fallthrough
CT: control target
= control target key end

     0   :  { %s178_s6 = smov 512   ;;  %s179_s7 = smov 128   ;;  %s254_s0 = inlined_call_operand.hbm [shape: f32[3,16,256], index: 0, kind: input, shape index: {}]   ;;  %s255_s1 = inlined_call_operand.hbm [shape: f32[3,4,256], index: 1, kind: output, shape index: {}]  }
   0x1   :  { %18 = sst [smem:[#allocation4]] %s178_s6  ;;  %s180_s8 = smov 2  }
   0x2   :  { %20 = sst [smem:[#allocation4 + $0x1]] %s179_s7  ;;  %s181_s9 = smov 64  }
   0x3   :  { %22 = sst [smem:[#allocation4 + $0x2]] %s180_s8  ;;  %s182_s10 = smov 1  }
   0x4   :  { %24 = sst [smem:[#allocation4 + $0x3]] %s179_s7  ;;  %s183_s11 = smov [#allocation2]  }
   0x5   :  { %26 = sst [smem:[#allocation4 + $0x4]] %s181_s9  ;;  %s184_s12 = smov [#allocation3]  }
   0x6   :  { %28 = sst [smem:[#allocation4 + $0x5]] %s182_s10  ;;  %s185_s13 = smov 0  }
   0x7   :  { %30 = dma.general %s254_s0, 96, %s255_s1, %s183_s11, %s184_s12, [#allocation4], %s185_s13, 0  }
   0x8   :  { %46 = sst [smem:[#allocation6]] %s178_s6  ;;  %s31_s20 = scalar_lea.hbm %s254_s0, 80 }
   0x9   :  { %48 = sst [smem:[#allocation6 + $0x1]] %s179_s7  ;;  %s32_s23 = scalar_lea.hbm %s255_s1, 16 }
   0xa   :  { %50 = sst [smem:[#allocation6 + $0x2]] %s180_s8  ;;  %s186_s24 = smov [#allocation2 + $0x1]  }
   0xb   :  { %52 = sst [smem:[#allocation6 + $0x3]] %s179_s7  ;;  %s187_s25 = smov [#allocation5]  }
   0xc   :  { %54 = sst [smem:[#allocation6 + $0x4]] %s181_s9  ;;  %s59_s28 = scalar_lea.hbm %s254_s0, 288 }
   0xd   :  { %56 = sst [smem:[#allocation6 + $0x5]] %s182_s10  ;;  %s60_s2 = scalar_lea.hbm %s255_s1, 32 }
   0xe   :  { %58 = dma.general %s31_s20, 96, %s32_s23, %s186_s24, %s187_s25, [#allocation6], %s185_s13, 0  }
   0xf   :  { %74 = sst [smem:[#allocation8]] %s178_s6  ;;  %s188_s3 = smov [#allocation2 + $0x2]  }
  0x10   :  { %76 = sst [smem:[#allocation8 + $0x1]] %s179_s7  ;;  %s189_s4 = smov [#allocation7]  }
  0x11   :  { %78 = sst [smem:[#allocation8 + $0x2]] %s180_s8  ;;  %s87_s12 = scalar_lea.hbm %s254_s0, 368 }
  0x12   :  { %80 = sst [smem:[#allocation8 + $0x3]] %s179_s7  ;;  %s88_s16 = scalar_lea.hbm %s255_s1, 48 }
  0x13   :  { %82 = sst [smem:[#allocation8 + $0x4]] %s181_s9  ;;  %s190_s17 = smov [#allocation2 + $0x3]  }
  0x14   :  { %84 = sst [smem:[#allocation8 + $0x5]] %s182_s10 }
  0x15   :  { %86 = dma.general %s59_s28, 96, %s60_s2, %s188_s3, %s189_s4, [#allocation8], %s185_s13, 0  }
  0x16   :  { %102 = sst [smem:[#allocation10]] %s178_s6  ;;  %s191_s6 = smov [#allocation9]  }
  0x17   :  { %104 = sst [smem:[#allocation10 + $0x1]] %s179_s7 }
  0x18   :  { %106 = sst [smem:[#allocation10 + $0x2]] %s180_s8 }
  0x19   :  { %108 = sst [smem:[#allocation10 + $0x3]] %s179_s7 }
  0x1a   :  { %110 = sst [smem:[#allocation10 + $0x4]] %s181_s9 }
  0x1b   :  { %112 = sst [smem:[#allocation10 + $0x5]] %s182_s10 }
  0x1c   :  { %114 = dma.general %s87_s12, 96, %s88_s16, %s190_s17, %s191_s6, [#allocation10], %s185_s13, 0  }
  0x1d   :  { %170 = dma.done.wait [#allocation2], 96 }
  0x1e   :  { %171 = vsyncadd [#allocation2], 4294967200 }
  0x1f   :  { %172 = dma.done.wait [#allocation2 + $0x1], 96 }
  0x20   :  { %173 = vsyncadd [#allocation2 + $0x1], 4294967200 }
  0x21   :  { %174 = dma.done.wait [#allocation2 + $0x2], 96 }
  0x22   :  { %175 = vsyncadd [#allocation2 + $0x2], 4294967200 }
  0x23   :  { %176 = dma.done.wait [#allocation2 + $0x3], 96 }
  0x24   :  { %177 = vsyncadd [#allocation2 + $0x3], 4294967200 }
  0x25   :  { %125 = vsyncmov [#allocation2] }
  0x28   :  { %s126_s0 = vpop.sfrf %125 }
  0x29   :  { %p152_p0 = scmp.ne.s32.totalorder %s126_s0, 0 }
  0x2b   :  { %130 = shalt.err (%p152_p0)  }
  0x2c   :  { %132 = vsyncmov [#allocation2 + $0x1] }
  0x2f   :  { %s133_s1 = vpop.sfrf %132 }
  0x30   :  { %p153_p1 = scmp.ne.s32.totalorder %s133_s1, 0 }
  0x32   :  { %137 = shalt.err (%p153_p1)  }
  0x33   :  { %139 = vsyncmov [#allocation2 + $0x2] }
  0x36   :  { %s140_s7 = vpop.sfrf %139 }
  0x37   :  { %p154_p2 = scmp.ne.s32.totalorder %s140_s7, 0 }
  0x39   :  { %144 = shalt.err (%p154_p2)  }
  0x3a   :  { %146 = vsyncmov [#allocation2 + $0x3] }
  0x3d   :  { %s147_s8 = vpop.sfrf %146 }
  0x3e   :  { %p155_p3 = scmp.ne.s32.totalorder %s147_s8, 0 }
  0x40   :  { %151 = shalt.err (%p155_p3)  }

</bundles_post_ra>
